<compile_context>
chip_gen: v7x
topology: tpu7x:2x2x1
jax: 0.10.0
libtpu: 0.0.40
codegen_flags: <defaults>
</compile_context>

<pallas_src>
import functools
import math

import jax
import jax.numpy as jnp
from jax.experimental import pallas as pl
from jax.experimental.pallas import tpu as pltpu


def _round_up(x, m):
    return ((x + m - 1) // m) * m


def _vmem_limit(need_bytes):
    # Explicit scoped-VMEM request (the 16/32 MiB default silently caps block sizes).
    # Our chosen block sizes keep this <= ~56 MiB, safe even on v7x (64 MiB/TC).
    return int(min(64 << 20, max(32 << 20, need_bytes + (8 << 20))))


# ---------------------------------------------------------------------------
# Fused path: one grid step per batch element, full (C, S_pad) slab in VMEM.
# ---------------------------------------------------------------------------
def scse_fused_kernel(u_ref, w_sq_ref, w_ex_ref, w_sp_ref, o_ref, *, inv_s):
    # u_ref: (C, S_pad); w_sq: (C//2, C); w_ex: (C, C//2); w_sp: (1, C)  (weights are f32)
    # cSE gate: pool in f32 WITHOUT materializing an f32 copy of the slab, then two
    # tiny channel matvecs directly on the (C, 1) vector (no sublane->lane relayouts).
    pooled = jnp.sum(u_ref[...], axis=-1, keepdims=True, dtype=jnp.float32) * inv_s  # (C, 1)
    h = jnp.dot(w_sq_ref[...], pooled, preferred_element_type=jnp.float32)           # (C//2, 1)
    e = jnp.dot(w_ex_ref[...], h, preferred_element_type=jnp.float32)                # (C, 1)
    s_c = jax.nn.sigmoid(e)                                                          # (C, 1)

    # sSE gate: 1x1x1 conv C->1 == channel contraction, one value per voxel.
    u = u_ref[...]                                                                   # (C, S_pad), input dtype
    w_sp = w_sp_ref[...].astype(u_ref.dtype)                                         # (1, C)
    q = jnp.dot(w_sp, u, preferred_element_type=jnp.float32)                         # (1, S_pad)
    s_s = jax.nn.sigmoid(q)

    # out = U * (s_c + s_s); keep all full-slab math in the input dtype.
    gate = s_c.astype(u_ref.dtype) + s_s.astype(u_ref.dtype)                         # (C, S_pad)
    o_ref[...] = u * gate


def _scse_fused(u_flat, w_sq, w_ex, w_sp, *, inv_s, n, c, s_pad, itemsize):
    weight_bytes = 4 * (w_sq.size + w_ex.size + w_sp.size)
    return pl.pallas_call(
        functools.partial(scse_fused_kernel, inv_s=inv_s),
        out_shape=jax.ShapeDtypeStruct((n, c, s_pad), u_flat.dtype),
        grid_spec=pltpu.PrefetchScalarGridSpec(
            num_scalar_prefetch=0,
            grid=(n,),
            in_specs=[
                pl.BlockSpec((None, c, s_pad), lambda i: (i, 0, 0)),
                pl.BlockSpec((c // 2, c), lambda i: (0, 0)),
                pl.BlockSpec((c, c // 2), lambda i: (0, 0)),
                pl.BlockSpec((1, c), lambda i: (0, 0)),
            ],
            out_specs=pl.BlockSpec((None, c, s_pad), lambda i: (i, 0, 0)),
        ),
        compiler_params=pltpu.CompilerParams(
            dimension_semantics=("parallel",),
            vmem_limit_bytes=_vmem_limit(4 * c * s_pad * itemsize + weight_bytes),
        ),
        cost_estimate=pl.CostEstimate(
            flops=int(6 * n * c * s_pad),
            transcendentals=int(n * (s_pad + c)),
            bytes_accessed=int(2 * n * c * s_pad * itemsize + weight_bytes),
        ),
    )(u_flat, w_sq, w_ex, w_sp)


# ---------------------------------------------------------------------------
# Two-pass tiled path (large C*S, e.g. v7x VMEM fallback).
# ---------------------------------------------------------------------------
def pool_gate_kernel(u_ref, w_sq_ref, w_ex_ref, gate_ref, *, inv_s):
    # Accumulate the per-channel sum across S tiles in the resident output block,
    # then turn it into the sigmoid channel gate on the last tile.
    si = pl.program_id(1)

    @pl.when(si == 0)
    def _():
        gate_ref[...] = jnp.zeros_like(gate_ref)

    gate_ref[...] += jnp.sum(u_ref[...], axis=-1, keepdims=True, dtype=jnp.float32)

    @pl.when(si == pl.num_programs(1) - 1)
    def _():
        pooled = gate_ref[...] * inv_s                                          # (C, 1)
        h = jnp.dot(w_sq_ref[...], pooled, preferred_element_type=jnp.float32)  # (C//2, 1)
        e = jnp.dot(w_ex_ref[...], h, preferred_element_type=jnp.float32)       # (C, 1)
        gate_ref[...] = jax.nn.sigmoid(e)


def apply_kernel(u_ref, gate_ref, w_sp_ref, o_ref):
    # u_ref: (C, tS); gate_ref: (C, 1) f32 channel gate; w_sp_ref: (1, C) f32.
    u = u_ref[...]
    w_sp = w_sp_ref[...].astype(u_ref.dtype)
    q = jnp.dot(w_sp, u, preferred_element_type=jnp.float32)                    # (1, tS)
    s_s = jax.nn.sigmoid(q)
    gate = gate_ref[...].astype(u_ref.dtype) + s_s.astype(u_ref.dtype)          # (C, tS)
    o_ref[...] = u * gate


def _scse_two_pass(u_flat, w_sq, w_ex, w_sp, *, inv_s, n, c, s_pad, t_s, itemsize):
    n_s = s_pad // t_s
    weight_bytes = 4 * (w_sq.size + w_ex.size + w_sp.size)

    # Pass 1: per-(batch, channel) sigmoid gate (whole cSE branch up to the gate).
    gate = pl.pallas_call(
        functools.partial(pool_gate_kernel, inv_s=inv_s),
        out_shape=jax.ShapeDtypeStruct((n, c, 1), jnp.float32),
        grid_spec=pltpu.PrefetchScalarGridSpec(
            num_scalar_prefetch=0,
            grid=(n, n_s),
            in_specs=[
                pl.BlockSpec((None, c, t_s), lambda i, s: (i, 0, s)),
                pl.BlockSpec((c // 2, c), lambda i, s: (0, 0)),
                pl.BlockSpec((c, c // 2), lambda i, s: (0, 0)),
            ],
            out_specs=pl.BlockSpec((None, c, 1), lambda i, s: (i, 0, 0)),
        ),
        compiler_params=pltpu.CompilerParams(
            dimension_semantics=("parallel", "arbitrary"),
            vmem_limit_bytes=_vmem_limit(2 * c * t_s * itemsize + weight_bytes),
        ),
        cost_estimate=pl.CostEstimate(
            flops=int(n * c * s_pad + 2 * n * c * c),
            transcendentals=int(n * c),
            bytes_accessed=int(n * c * s_pad * itemsize + weight_bytes + 4 * n * c),
        ),
    )(u_flat, w_sq, w_ex)

    # Pass 2: stream lane-dense (C, tS) tiles; both grid axes are independent.
    out_flat = pl.pallas_call(
        apply_kernel,
        out_shape=jax.ShapeDtypeStruct((n, c, s_pad), u_flat.dtype),
        grid_spec=pltpu.PrefetchScalarGridSpec(
            num_scalar_prefetch=0,
            grid=(n, n_s),
            in_specs=[
                pl.BlockSpec((None, c, t_s), lambda i, s: (i, 0, s)),
                pl.BlockSpec((None, c, 1), lambda i, s: (i, 0, 0)),
                pl.BlockSpec((1, c), lambda i, s: (0, 0)),
            ],
            out_specs=pl.BlockSpec((None, c, t_s), lambda i, s: (i, 0, s)),
        ),
        compiler_params=pltpu.CompilerParams(
            dimension_semantics=("parallel", "parallel"),
            vmem_limit_bytes=_vmem_limit(4 * c * t_s * itemsize + weight_bytes),
        ),
        cost_estimate=pl.CostEstimate(
            flops=int(5 * n * c * s_pad),
            transcendentals=int(n * s_pad),
            bytes_accessed=int(2 * n * c * s_pad * itemsize + 4 * n * c + weight_bytes),
        ),
    )(u_flat, gate, w_sp)
    return out_flat


# ---------------------------------------------------------------------------
# Wrapper
# ---------------------------------------------------------------------------
_FUSED_VMEM_SOFT_CAP = 40 << 20   # double-buffered slab budget (safe on v7x's 64 MiB/TC)
_TILE_VMEM_TARGET = 8 << 20       # per-step footprint target for the tiled path


def scse_forward(u, w_squeeze, w_excite, w_spatial, *, tile_s=None):
    """scSE forward.
    u: (N, C, D, H, W); w_squeeze: (C//2, C); w_excite: (C, C//2); w_spatial: (1, C)."""
    n, c, d, h, w = u.shape
    s = d * h * w
    itemsize = jnp.dtype(u.dtype).itemsize
    weight_bytes = 4 * (w_squeeze.size + w_excite.size + w_spatial.size)

    s_128 = _round_up(s, 128)  # lane-dense (unmasked-store) spatial extent
    if tile_s is None:
        fused_need = 4 * c * s_128 * itemsize + weight_bytes
        if fused_need <= _FUSED_VMEM_SOFT_CAP:
            t_s = s_128
        else:
            t_s = max(512, ((_TILE_VMEM_TARGET // (4 * c * itemsize)) // 128) * 128)
            t_s = min(t_s, s_128)
    else:
        t_s = min(_round_up(tile_s, 128), s_128)

    s_pad = _round_up(s, t_s)
    u_flat = u.reshape(n, c, s)
    if s_pad != s:
        # Zero padding does not perturb the global-average pool (we divide by the
        # true S), and padded output columns are sliced off below.
        u_flat = jnp.pad(u_flat, ((0, 0), (0, 0), (0, s_pad - s)))

    # Pass weights in the compute dtype (f32) so no per-step casts are needed.
    w_squeeze = w_squeeze.astype(jnp.float32)
    w_excite = w_excite.astype(jnp.float32)
    w_spatial = w_spatial.astype(jnp.float32)

    inv_s = 1.0 / float(s)
    if s_pad == t_s:
        out_flat = _scse_fused(u_flat, w_squeeze, w_excite, w_spatial,
                               inv_s=inv_s, n=n, c=c, s_pad=s_pad, itemsize=itemsize)
    else:
        out_flat = _scse_two_pass(u_flat, w_squeeze, w_excite, w_spatial,
                                  inv_s=inv_s, n=n, c=c, s_pad=s_pad, t_s=t_s,
                                  itemsize=itemsize)

    if s_pad != s:
        out_flat = out_flat[:, :, :s]
    return out_flat.reshape(n, c, d, h, w)


def scse_reference(u, w_squeeze, w_excite, w_spatial):
    """Pure-JAX reference of the PyTorch scSE forward."""
    # cSE
    z = jnp.mean(u, axis=(2, 3, 4))                          # (N, C)
    z = z @ w_squeeze.T                                      # (N, C//2)
    z = z @ w_excite.T                                       # (N, C)
    s_c = jax.nn.sigmoid(z)[:, :, None, None, None]
    u_cse = u * s_c
    # sSE
    q = jnp.einsum('ncdhw,c->ndhw', u, w_spatial[0])         # (N, D, H, W)
    s_s = jax.nn.sigmoid(q)[:, None, :, :, :]
    u_sse = u * s_s
    return u_cse + u_sse


if __name__ == "__main__":
    key = jax.random.PRNGKey(0)
    k_u, k_w1, k_w2, k_w3 = jax.random.split(key, 4)

    # Small shapes consistent with the module: N=2, C=8, D=4, H=8, W=8 (S = 256).
    N, C, D, H, W = 2, 8, 4, 8, 8
    u = jax.random.normal(k_u, (N, C, D, H, W), dtype=jnp.float32)

    # PyTorch Conv3d default init (uniform in +/- 1/sqrt(fan_in), kernel_size=1).
    b1 = 1.0 / math.sqrt(C)
    w_squeeze = jax.random.uniform(k_w1, (C // 2, C), jnp.float32, minval=-b1, maxval=b1)
    b2 = 1.0 / math.sqrt(C // 2)
    w_excite = jax.random.uniform(k_w2, (C, C // 2), jnp.float32, minval=-b2, maxval=b2)
    w_spatial = jax.random.uniform(k_w3, (1, C), jnp.float32, minval=-b1, maxval=b1)

    ref = scse_reference(u, w_squeeze, w_excite, w_spatial)

    # Path 1: fused single-pass (slab fits VMEM).
    out_fused = jax.block_until_ready(scse_forward(u, w_squeeze, w_excite, w_spatial))
    assert out_fused.shape == u.shape and out_fused.dtype == u.dtype
    assert jnp.allclose(out_fused, ref, rtol=1e-5, atol=1e-5), "fused path mismatch"

    # Path 2: two-pass S-tiled fallback (forced small tile to exercise it).
    out_tiled = jax.block_until_ready(
        scse_forward(u, w_squeeze, w_excite, w_spatial, tile_s=128))
    assert out_tiled.shape == u.shape and out_tiled.dtype == u.dtype
    assert jnp.allclose(out_tiled, ref, rtol=1e-5, atol=1e-5), "tiled path mismatch"

    print("KERNEL_OK")
</pallas_src>

<mosaic_0001>
module attributes {stable_mosaic.version = 11 : i64} {
  func.func @scse_fused_kernel(%arg0: i32, %arg1: memref<1x8x256xf32, #tpu.memory_space<vmem>>, %arg2: memref<4x8xf32, #tpu.memory_space<vmem>>, %arg3: memref<8x4xf32, #tpu.memory_space<vmem>>, %arg4: memref<1x8xf32, #tpu.memory_space<vmem>>, %arg5: memref<1x8x256xf32, #tpu.memory_space<vmem>>) attributes {dimension_semantics = [#tpu.dimension_semantics<parallel>], iteration_bounds = array<i64: 2>, scalar_prefetch = 0 : i64, scratch_operands = 0 : i64, tpu.core_type = #tpu.core_type<tc>, window_params = [{transform_indices = @transform_0, window_bounds = array<i64: 1, 8, 256>}, {pipeline_mode = #tpu.pipeline_mode<synchronous>, transform_indices = @transform_1, window_bounds = array<i64: 4, 8>}, {pipeline_mode = #tpu.pipeline_mode<synchronous>, transform_indices = @transform_2, window_bounds = array<i64: 8, 4>}, {pipeline_mode = #tpu.pipeline_mode<synchronous>, transform_indices = @transform_3, window_bounds = array<i64: 1, 8>}, {transform_indices = @transform_4, window_bounds = array<i64: 1, 8, 256>}]} {
    %c0 = arith.constant 0 : index
    %c0_0 = arith.constant 0 : index
    %c0_1 = arith.constant 0 : index
    %0 = vector.load %arg1[%c0, %c0_0, %c0_1] : memref<1x8x256xf32, #tpu.memory_space<vmem>>, vector<1x8x256xf32>
    %1 = vector.shape_cast %0 : vector<1x8x256xf32> to vector<8x256xf32>
    %cst = arith.constant dense<0.000000e+00> : vector<8xf32>
    %2 = vector.multi_reduction <add>, %1, %cst [1] : vector<8x256xf32> to vector<8xf32>
    %3 = vector.shape_cast %2 : vector<8xf32> to vector<8x1xf32>
    %cst_2 = arith.constant 3.906250e-03 : f32
    %4 = vector.broadcast %cst_2 : f32 to vector<8x1xf32>
    %5 = arith.mulf %3, %4 : vector<8x1xf32>
    %c0_3 = arith.constant 0 : index
    %c0_4 = arith.constant 0 : index
    %6 = vector.load %arg2[%c0_3, %c0_4] : memref<4x8xf32, #tpu.memory_space<vmem>>, vector<4x8xf32>
    %cst_5 = arith.constant dense<0.000000e+00> : vector<4x1xf32>
    %7 = tpu.matmul %6, %5, %cst_5 {dimension_numbers = #tpu.dot_dimension_numbers<[1], [0], [0], [1], [0, 0, 1, 1], [], []>} : vector<4x8xf32>, vector<8x1xf32>, vector<4x1xf32> -> vector<4x1xf32>
    %c0_6 = arith.constant 0 : index
    %c0_7 = arith.constant 0 : index
    %8 = vector.load %arg3[%c0_6, %c0_7] : memref<8x4xf32, #tpu.memory_space<vmem>>, vector<8x4xf32>
    %cst_8 = arith.constant dense<0.000000e+00> : vector<8x1xf32>
    %9 = tpu.matmul %8, %7, %cst_8 {dimension_numbers = #tpu.dot_dimension_numbers<[1], [0], [0], [1], [0, 0, 1, 1], [], []>} : vector<8x4xf32>, vector<4x1xf32>, vector<8x1xf32> -> vector<8x1xf32>
    %10 = arith.negf %9 : vector<8x1xf32>
    %11 = math.exp %10 : vector<8x1xf32>
    %cst_9 = arith.constant 1.000000e+00 : f32
    %12 = vector.broadcast %cst_9 : f32 to vector<8x1xf32>
    %13 = arith.addf %12, %11 : vector<8x1xf32>
    %14 = arith.divf %12, %13 : vector<8x1xf32>
    %c0_10 = arith.constant 0 : index
    %c0_11 = arith.constant 0 : index
    %c0_12 = arith.constant 0 : index
    %15 = vector.load %arg1[%c0_10, %c0_11, %c0_12] : memref<1x8x256xf32, #tpu.memory_space<vmem>>, vector<1x8x256xf32>
    %16 = vector.shape_cast %15 : vector<1x8x256xf32> to vector<8x256xf32>
    %c0_13 = arith.constant 0 : index
    %c0_14 = arith.constant 0 : index
    %17 = vector.load %arg4[%c0_13, %c0_14] : memref<1x8xf32, #tpu.memory_space<vmem>>, vector<1x8xf32>
    %cst_15 = arith.constant dense<0.000000e+00> : vector<1x256xf32>
    %18 = tpu.matmul %17, %16, %cst_15 {dimension_numbers = #tpu.dot_dimension_numbers<[1], [0], [0], [1], [0, 0, 1, 1], [], []>} : vector<1x8xf32>, vector<8x256xf32>, vector<1x256xf32> -> vector<1x256xf32>
    %19 = arith.negf %18 : vector<1x256xf32>
    %20 = math.exp %19 : vector<1x256xf32>
    %cst_16 = arith.constant 1.000000e+00 : f32
    %21 = vector.broadcast %cst_16 : f32 to vector<1x256xf32>
    %22 = arith.addf %21, %20 : vector<1x256xf32>
    %23 = arith.divf %21, %22 : vector<1x256xf32>
    %24 = vector.broadcast %14 : vector<8x1xf32> to vector<8x256xf32>
    %25 = vector.broadcast %23 : vector<1x256xf32> to vector<8x256xf32>
    %26 = arith.addf %24, %25 : vector<8x256xf32>
    %27 = arith.mulf %16, %26 : vector<8x256xf32>
    %c0_17 = arith.constant 0 : index
    %c0_18 = arith.constant 0 : index
    %c0_19 = arith.constant 0 : index
    %28 = vector.load %arg5[%c0_17, %c0_18, %c0_19] : memref<1x8x256xf32, #tpu.memory_space<vmem>>, vector<1x8x256xf32>
    %29 = vector.shape_cast %28 : vector<1x8x256xf32> to vector<8x256xf32>
    %30 = vector.shape_cast %27 : vector<8x256xf32> to vector<1x8x256xf32>
    tpu.vector_store %arg5[%c0_17, %c0_18, %c0_19], %30 {strides = array<i32>} : memref<1x8x256xf32, #tpu.memory_space<vmem>>, vector<1x8x256xf32>,
    return
  }
  func.func @transform_0(%arg0: i32) -> (i32, i32, i32) {
    %c0_i32 = arith.constant 0 : i32
    %c0_i32_0 = arith.constant 0 : i32
    %c0_i32_1 = arith.constant 0 : i32
    return %arg0, %c0_i32, %c0_i32_0 : i32, i32, i32
  }
  func.func @transform_1(%arg0: i32) -> (i32, i32) {
    %c0_i32 = arith.constant 0 : i32
    %c0_i32_0 = arith.constant 0 : i32
    %c0_i32_1 = arith.constant 0 : i32
    return %c0_i32, %c0_i32_0 : i32, i32
  }
  func.func @transform_2(%arg0: i32) -> (i32, i32) {
    %c0_i32 = arith.constant 0 : i32
    %c0_i32_0 = arith.constant 0 : i32
    %c0_i32_1 = arith.constant 0 : i32
    return %c0_i32, %c0_i32_0 : i32, i32
  }
  func.func @transform_3(%arg0: i32) -> (i32, i32) {
    %c0_i32 = arith.constant 0 : i32
    %c0_i32_0 = arith.constant 0 : i32
    %c0_i32_1 = arith.constant 0 : i32
    return %c0_i32, %c0_i32_0 : i32, i32
  }
  func.func @transform_4(%arg0: i32) -> (i32, i32, i32) {
    %c0_i32 = arith.constant 0 : i32
    %c0_i32_0 = arith.constant 0 : i32
    %c0_i32_1 = arith.constant 0 : i32
    return %arg0, %c0_i32, %c0_i32_0 : i32, i32, i32
  }
}

</mosaic_0001>

<bundles_post_ra>
// kernel: tpu_custom_call.1
= control target key start
LH: loop header
LB: loop body
LE: loop exit
PB: predicated region body
PF: predicated region fallthrough
CT: control target
= control target key end

     0   :  { %9 = vsyncpa [#allocation3], 0  ;;  %s982_s0 = inlined_call_operand.hbm [shape: f32[2,8,256], index: 0, kind: input, shape index: {}]   ;;  %s983_s1 = inlined_call_operand.vmem [shape: f32[4,8], index: 1, kind: input, shape index: {}]   ;;  %s984_s2 = inlined_call_operand.vmem [shape: f32[8,4], index: 2, kind: input, shape index: {}]   ;;  %s985_s3 = inlined_call_operand.vmem [shape: f32[1,8], index: 3, kind: input, shape index: {}]   ;;  %s986_s4 = inlined_call_operand.hbm [shape: f32[2,8,256], index: 4, kind: output, shape index: {}]  }
   0x1   :  { %11 = vsyncpa [#allocation3 + $0x1], 0 }
   0x2   :  { %12 = vsyncpa [#allocation4], 0 }
   0x3   :  { %14 = vsyncpa [#allocation4 + $0x1], 0  ;;  %s798_s15 = smov 0   ;;  %s800_s16 = smov 0  }
   0x4   :  { %s802_s17 = smov 0   ;;  %s804_s18 = smov 0  }
   0x5 LB: > { %s819_s19 = sadd.s32 4294967295, %s766_s18   ;;  %s571_s20 = sadd.s32 4294967294, %s766_s18   ;;  %s766_s18 = sphi %s804_s18, %s1001_s18   ;;  %s762_s17 = sphi %s802_s17, %s1000_s17   ;;  %s758_s16 = sphi %s800_s16, %s999_s16   ;;  %s754_s15 = sphi %s798_s15, %s998_s15  }
   0x6   : > { %s823_s21 = sadd.s32 1, %s766_s18   ;;  %s27_s22 = sadd.s32 1, %s762_s17 }
   0x7   : > { %s24_s23 = ssub.s32 %s766_s18, %s823_s21  ;;  %p34_p0 = scmp.ne.s32.totalorder %s762_s17, %s758_s16 }
   0x8   : > { %p25_p1 = scmp.eq.s32.totalorder %s24_s23, 0  ;;  %p35_p2 = scmp.eq.s32.totalorder %s766_s18, 0 }
   0x9   : > { %p40_p3 = scmp.ne.s32.totalorder %s758_s16, %s754_s15  ;;  %p41_p4 = scmp.eq.s32.totalorder %s819_s19, 0 }
   0xa   : > { %s835_s24 = scalar_select %p25_p1, %s762_s17, %s27_s22  }
   0xb   : > { %p837_p5 = por %p35_p2, %p34_p0  ;;  %p841_p6 = por %p41_p4, %p40_p3 }
   0xc   : > { %p127_p7 = scmp.eq.s32.totalorder %s819_s19, 1  ;;  %p133_p8 = scmp.eq.s32.totalorder %s571_s20, 1 }
   0xd   : > { %p620_p10 = scmp.lt.s32.totalorder %s766_s18, 2  ;;  %s162_s29 = sand.u32 1, %s762_s17  }
   0xe   : > { %p848_p11 = por %p127_p7, %p34_p0  ;;  %p852_p12 = por %p133_p8, %p40_p3 }
   0xf   : > { %s592_s30 = sshll.u32 %s766_s18, 8  ;;  %s574_s5 = sshll.u32 %s162_s29, 4 }
  0x10   : > { %s990_s27 = scalar_select %p848_p11, 1, 0 }
  0x11   : > { %s991_s28 = scalar_select %p852_p12, 1, 0 }
  0x12   : > { %s861_s8 = scalar_lea.hbm %s982_s0, %s592_s30  ;;  %s166_s9 = scalar_lea.vmem [#allocation2], %s574_s5 }
  0x13   : > { %s174_s10 = sshll.u32 %s166_s9, 4  ;;  %p865_p13 = pnand %p620_p10, %p837_p5  ;;  %s869_s10 = int_to_ptr.vmem [resolvable:$true] %s174_s10 }
  0x14   : > { %s163_s12 = scalar_lea.sflag [#allocation3], %s162_s29  ;;  %s670_s13 = scalar_lea.hbm %s861_s8, 256 }
  0x15   : > { %p671_p2 = scmp.ne.s32.totalorder %s861_s8, %s670_s13  ;;  %p672_p3 = pneg %p865_p13 }
  0x16   : > { %s675_s22 = scalar_lea.hbm %s982_s0, 512  ;;  %p676_p5 = scmp.lt.u32.totalorder %s861_s8, %s982_s0 }
  0x17   : > { %p673_p4 = pnand %p672_p3, %p671_p2  ;;  %p677_p8 = scmp.lt.u32.totalorder %s675_s22, %s670_s13 }
  0x18   : > { %p679_p9 = scmp.lt.u32.totalorder %s670_s13, %s861_s8 }
  0x19   : > { %p674_p7 = pneg %p673_p4  ;;  %p678_p10 = por %p677_p8, %p676_p5 }
  0x1b   : > { %p680_p0 = por %p679_p9, %p678_p10 }
  0x1d   : > { %p681_p1 = pnand %p680_p0, %p674_p7 }
  0x1f   : > { %684 = shalt.err (!%p681_p1)
}
  0x20   : > { %s685_s29 = scalar_lea.vmem %s869_s10, 256  ;;  %s768_s30 = smov [#allocation2]  }
  0x21   : > { %p686_p2 = scmp.ne.s32.totalorder %s869_s10, %s685_s29  ;;  %s690_s5 = sshll.u32 %s768_s30, 4  ;;  %s691_s5 = int_to_ptr.vmem [resolvable:$false] %s690_s5 }
  0x22   : > { %s692_s6 = scalar_lea.vmem %s691_s5, 512  ;;  %p693_p11 = scmp.lt.s32.totalorder %s869_s10, %s691_s5 }
  0x23   : > { %p688_p4 = pnand %p686_p2, %p672_p3  ;;  %p694_p5 = scmp.lt.s32.totalorder %s692_s6, %s685_s29 }
  0x25   : > { %p689_p12 = pneg %p688_p4  ;;  %p695_p8 = por %p694_p5, %p693_p11 }
  0x27   : > { %p696_p9 = pnand %p695_p8, %p689_p12 }
  0x29   : > { %699 = shalt.err (!%p696_p9)
}
  0x2a   : > { %615 = dma.hbm_to_vmem [thread:$0]  (!%p865_p13), %s861_s8, 256, %s869_s10, %s163_s12  }
  0x2b   : > { %p993_p0 = scmp.lt.s32.totalorder %s766_s18, 3  ;;  %p994_p1 = scmp.ge.s32.totalorder %s766_s18, 1 }
  0x2d   : > { %p180_p3 = pnand %p994_p1, %p993_p0 }
  0x2e   : > { %s903_s7 = sand.u32 (!%p180_p3), 1, %s758_s16  }
  0x2f   : > { %183 = sbr.rel (%p180_p3) target bundleno = 800 (0x320), region = 36  ;;  %s578_s9 = sshll.u32 (!%p180_p3), %s903_s7, 4 }
  0x30   : > { %s186_s13 = scalar_lea.sflag (!%p180_p3), [#allocation3], %s903_s7  ;;  %s189_s11 = scalar_lea.vmem (!%p180_p3), [#allocation2], %s578_s9 }
  0x36   : > { %745 = dma.done.wait (%p841_p6), %s186_s13, 256  }
  0x37   : > { %747 = vsyncadd (%p841_p6), %s186_s13, 4294967040  ;;  %v913_v0 = vld [vmem:[%s189_s11] sm:$0xff]  ;;  %v915_v1 = vld [vmem:[%s189_s11 + $0x8] sm:$0xff]  ;;  %v769_v3 = vmov 0.0   ;;  %vm770_vm0 = vmmov 0   ;;  %vm221_vm1 = vcmask 64512   ;;  %v472_v26 = vlaneseq }
  0x38   : > { %v216_v2 = vadd.f32 %v915_v1, %v913_v0  ;;  %598 = vmatprep.subr.mxu0 %v769_v3  ;;  %603 = vmatprep.subr.mxu1 %v769_v3  ;;  %v220_v6 = vld [vmem:[%s983_s1] sm:$0xf]  ;;  %vm300_vm2 = vcmask 1043456   ;;  %vm296_vm3 = vcmask 31744   ;;  %v771_v11 = vmov 0   ;;  %s593_s22 = sshll.u32 %s819_s19, 8 }
  0x39   : > { %600 = vmatprep.mubr.msk.f32.mxu0 %vm770_vm0, %v769_v3  ;;  %605 = vmatprep.mubr.msk.f32.mxu1 %vm770_vm0, %v769_v3  ;;  %v380_v7 = vld [vmem:[%s985_s3] sm:$0x1]  ;;  %v473_v27 = vshrl.u32 %v472_v26, 7  ;;  %s213_s23 = scalar_lea.vmem [#allocation5], %s578_s9  ;;  %s938_s5 = scalar_lea.hbm %s986_s4, %s593_s22 }
  0x3a   : > { %217 = vadd.xlane.f32.xlu0 %v216_v2  ;;  %v295_v8 = vld [vmem:[%s984_s2] sm:$0xff]  ;;  %s501_s25 = sshll.u32 %s213_s23, 4  ;;  %s487_s19 = scalar_lea.sflag [#allocation4], %s903_s7  ;;  %s940_s25 = int_to_ptr.vmem [resolvable:$true] %s501_s25 }
  0x3b   : > { %657 = vset.pattern.permute.xlu0 %v771_v11  ;;  %v474_v29 = vsub.s32 0, %v473_v27  ;;  %s700_s6 = scalar_lea.vmem %s940_s25, 256  ;;  %p995_p11 = scmp.ne.s32.totalorder %s990_s27, 0 }
  0x3c   : > { %p701_p6 = scmp.ne.s32.totalorder %s940_s25, %s700_s6  ;;  %s772_s9 = smov [#allocation5]  }
  0x3d   : > { %s704_s13 = sshll.u32 %s772_s9, 4  ;;  %s705_s13 = int_to_ptr.vmem [resolvable:$false] %s704_s13 }
  0x3e   : > { %p702_p12 = pnand %p701_p6, %p995_p11  ;;  %s706_s11 = scalar_lea.vmem %s705_s13, 512 }
  0x3f   : > { %p707_p7 = scmp.lt.s32.totalorder %s940_s25, %s705_s13  ;;  %p708_p10 = scmp.lt.s32.totalorder %s706_s11, %s700_s6 }
  0x40   : > { %p703_p13 = pneg %p702_p12 }
  0x41   : > { %p709_p2 = por %p708_p10, %p707_p7 }
  0x43   : > { %p710_p4 = pnand %p709_p2, %p703_p13 }
  0xc7   : > { %v218_v4 = vpop.xlane.xlu0 %217 }
  0xc8   : > { %v219_v5 = vmul.f32 0.00390625, %v218_v4 }
  0xca   : > { %599 = vmatpush3.msra.mxu0 %v219_v5 }
  0xcb   : > { %601 = vmatmul.mubr.msk.f32.vlgmr.msra.gmra.mrb[0].mxu0 %vm221_vm1, %v220_v6  ;;  %384 = vmatprep.subr.mxu0 %v915_v1 }
  0xcc   : > { %385 = vmatpush1.msra.mxu0 %v913_v0  ;;  %448 = vmatprep.mubr.f32.mxu0 %v769_v3 }
  0xcf   : > { %584 = vmatmul.mubr.msk.f32.vlgmr.msra.gmra.mrb[2].mxu0 %vm221_vm1, %v380_v7 }
 0x19e   : > { %v291_v9 = vpop.f32.mrb[0].mxu0 }
 0x19f   : > { %v602_v10 = vpop.f32.mrb[1].mxu0  ;;  %604 = vmatpush3.msk.msra.mxu1 %vm300_vm2, %v291_v9 }
 0x1a0   : > { %606 = vmatmul.mubr.msk.f32.vlgmr.msra.gmra.mrb[0].mxu1 %vm296_vm3, %v295_v8 }
 0x1a2   : > { %v450_v12 = vpop.f32.mrb[2].mxu0 }
 0x1a3   : > { %v452_v13 = vpop.f32.mrb[3].mxu0  ;;  %v585_v20 = vmul.f32 -1.442695, %v450_v12 }
 0x1a4   : > { %v586_v21 = vmul.f32 -1.442695, %v452_v13 }
 0x273   : > { %v370_v14 = vpop.f32.mrb[0].mxu1 }
 0x274   : > { %v583_v15 = vmul.f32 -1.442695, %v370_v14  ;;  %v607_v16 = vpop.f32.mrb[1].mxu1 }
 0x276   : > { %658 = vpow2.f32 %v583_v15 }
 0x280   : > { %v659_v17 = vpop.eup %658 }
 0x281   : > { %v377_v18 = vadd.f32 1.0, %v659_v17 }
 0x283   : > { %660 = vrcp.f32 %v377_v18 }
 0x284   : > { %662 = vpow2.f32 %v585_v20 }
 0x285   : > { %664 = vpow2.f32 %v586_v21 }
 0x28d   : > { %v661_v19 = vpop.eup %660 }
 0x28e   : > { %469 = vperm.xlu0 %657, %v661_v19   ;;  %v663_v22 = vpop.eup %662 }
 0x28f   : > { %v665_v23 = vpop.eup %664  ;;  %v461_v24 = vadd.f32 1.0, %v663_v22 }
 0x290   : > { %v462_v25 = vadd.f32 1.0, %v665_v23 }
 0x291   : > { %666 = vrcp.f32 %v461_v24 }
 0x292   : > { %668 = vrcp.f32 %v462_v25 }
 0x29b   : > { %v667_v28 = vpop.eup %666 }
 0x29c   : > { %v669_v30 = vpop.eup %668  ;;  %v475_v31 = vrot.slane %v667_v28, %v474_v29 }
 0x29d   : > { %v479_v32 = vrot.slane %v669_v30, %v474_v29 }
 0x30d   : > { %v470_v33 = vpop.permute.xlu0 %469 }
 0x30e   : > { %v480_v34 = vadd.f32 %v475_v31, %v470_v33  ;;  %v481_v35 = vadd.f32 %v479_v32, %v470_v33 }
 0x310   : > { %v482_v36 = vmul.f32 %v480_v34, %v913_v0  ;;  %v483_v37 = vmul.f32 %v481_v35, %v915_v1 }
 0x312   : > { %484 = vst [vmem:[%s213_s23] sm:$0xff] %v482_v36  ;;  %485 = vst [vmem:[%s213_s23 + $0x8] sm:$0xff] %v483_v37 }
 0x313   : > { %713 = shalt.err (!%p710_p4)
}
 0x314   : > { %s714_s7 = scalar_lea.hbm %s938_s5, 256  ;;  %s718_s26 = scalar_lea.hbm %s986_s4, 512 }
 0x315   : > { %p715_p5 = scmp.ne.s32.totalorder %s938_s5, %s714_s7  ;;  %p719_p0 = scmp.lt.u32.totalorder %s938_s5, %s986_s4 }
 0x316   : > { %p720_p1 = scmp.lt.u32.totalorder %s718_s26, %s714_s7  ;;  %p722_p6 = scmp.lt.u32.totalorder %s714_s7, %s938_s5 }
 0x317   : > { %p716_p8 = pnand %p715_p5, %p995_p11 }
 0x318   : > { %p721_p3 = por %p720_p1, %p719_p0 }
 0x319   : > { %p717_p9 = pneg %p716_p8 }
 0x31a   : > { %p723_p12 = por %p722_p6, %p721_p3 }
 0x31c   : > { %p724_p13 = pnand %p723_p12, %p717_p9 }
 0x31e   : > { %727 = shalt.err (!%p724_p13)
}
 0x31f   : > { %610 = dma.vmem_to_hbm [thread:$0]  (%p995_p11), %s940_s25, 256, %s938_s5, %s487_s19  }
 0x320 PF: > { %s513_s20 = sand.u32 1, %s754_s15   ;;  %p996_p7 = scmp.ne.s32.totalorder %s991_s28, 0 }
 0x321   : > { %p997_p10 = scmp.ge.s32.totalorder %s766_s18, 2  ;;  %s514_s22 = scalar_lea.sflag [#allocation4], %s513_s20 }
 0x323   : > { %p617_p2 = pnand %p997_p10, %p996_p7 }
 0x325   : > { %749 = dma.done.wait (!%p617_p2), %s514_s22, 256  }
 0x326   : > { %751 = vsyncadd (!%p617_p2), %s514_s22, 4294967040  ;;  %p17_p4 = scmp.ge.s32.totalorder %s823_s21, 4   ;;  %s998_s15 = smov %s758_s16 }
 0x327   : > { %s999_s16 = smov %s762_s17  ;;  %s1000_s17 = smov %s835_s24 }
 0x328   : > { %s1001_s18 = smov %s823_s21  ;;  %19 = sbr.rel (!%p17_p4) target bundleno = 5 (0x5), region = 81 }
 0x32f   :  { %519 = vsyncpa [#allocation3], 1 }
 0x330   :  { %521 = vsyncpa [#allocation3 + $0x1], 1 }
 0x331   :  { %522 = vsyncpa [#allocation4], 1 }
 0x332   :  { %524 = vsyncpa [#allocation4 + $0x1], 1 }

</bundles_post_ra>
